<compile_context>
chip_gen: v5e
topology: v5e:2x2
jax: 0.10.0
libtpu: 0.0.40
codegen_flags: <defaults>
</compile_context>

<pallas_src>
import functools

import jax
import jax.numpy as jnp
from jax.experimental import pallas as pl
from jax.experimental.pallas import tpu as pltpu


def bert_embeddings_kernel(ids_ref,      # SMEM [BS]        int32 (scalar prefetch: word ids)
                           tts_ref,      # VMEM [TILE, 1]   int32 (token type ids)
                           pos_ref,      # VMEM [TILE, H]   f32   (position rows for this tile)
                           wt_ref,       # VMEM [T, H]      f32   (token-type table, resident)
                           gamma_ref,    # VMEM [1, H]      f32
                           beta_ref,     # VMEM [1, H]      f32
                           ww_hbm,       # HBM  [V, H]      f32   (word table, manual DMA)
                           out_ref,      # VMEM [TILE, H]   f32
                           wbuf,         # VMEM scratch [TILE, H] f32 (gathered word rows)
                           sem,          # DMA semaphores (TILE,)
                           *, tile_bs, vocab_size, num_types, eps):
    base = pl.program_id(0) * tile_bs

    # --- word embeddings: per-row DMA gather from HBM (issue all, then wait) ---
    copies = []
    for r in range(tile_bs):
        wid = ids_ref[base + r]
        wid = jnp.clip(wid, 0, vocab_size - 1)      # guard against OOB DMA
        cp = pltpu.make_async_copy(
            ww_hbm.at[pl.ds(wid, 1), :],            # (1, H) row in HBM
            wbuf.at[pl.ds(r, 1), :],                # (1, H) slot in VMEM
            sem.at[r])
        cp.start()
        copies.append(cp)
    for cp in copies:
        cp.wait()

    words_emb = wbuf[...]                           # (TILE, H)

    # --- token-type embeddings: VPU select over tiny T (no matmul) -------------
    tts = tts_ref[...]                              # (TILE, 1) int32
    tt_emb = jnp.zeros_like(words_emb)
    for t in range(num_types):                      # static, T is small (2 for BERT)
        tt_emb = tt_emb + jnp.where(tts == t, 1.0, 0.0) * wt_ref[t:t + 1, :]

    # --- position embeddings: direct VMEM block read (aligned via index_map) ---
    emb = words_emb + pos_ref[...] + tt_emb         # (TILE, H)

    # --- BertLayerNorm (biased variance, eps=1e-12) -----------------------------
    mean = jnp.mean(emb, axis=-1, keepdims=True)
    centered = emb - mean
    var = jnp.mean(centered * centered, axis=-1, keepdims=True)
    normed = centered * jax.lax.rsqrt(var + eps)
    out = normed * gamma_ref[...] + beta_ref[...]

    # Dropout: inference mode => identity.
    # TODO(synk): training-mode dropout via pltpu.prng_seed / pltpu.prng_random_bits.
    out_ref[...] = out.astype(out_ref.dtype)


def bert_embeddings(input_ids, token_type_ids, word_w, pos_w, type_w,
                    ln_gamma, ln_beta, *, eps=1e-12, tile_bs=None):
    """Wrapper: flattens ids, tiles rows, calls the Pallas kernel, reshapes to [B,S,H]."""
    B, S = input_ids.shape
    V, H = word_w.shape
    P = pos_w.shape[0]
    T = type_w.shape[0]
    BS = B * S

    if tile_bs is None:
        # Biggest divisor of S that is a multiple of 8 and <= 512 rows.
        tile_bs = S
        while tile_bs > 512 or (tile_bs % 8 != 0 and tile_bs != S):
            tile_bs //= 2
    assert S % tile_bs == 0 and BS % tile_bs == 0, "tile_bs must divide S (and BS)"
    assert tile_bs % 8 == 0, "row tile must be a multiple of 8 sublanes"
    assert P >= S, "position table shorter than sequence"

    ids_flat = input_ids.reshape(BS).astype(jnp.int32)          # -> SMEM scalar prefetch
    tts_flat = token_type_ids.reshape(BS, 1).astype(jnp.int32)
    word_w32 = word_w.astype(jnp.float32)
    pos_w32 = pos_w.astype(jnp.float32)
    type_w32 = type_w.astype(jnp.float32)
    gamma2d = ln_gamma.reshape(1, H).astype(jnp.float32)
    beta2d = ln_beta.reshape(1, H).astype(jnp.float32)

    bps = S // tile_bs   # position blocks per sequence (tile i uses block i % bps)

    kernel = functools.partial(bert_embeddings_kernel, tile_bs=tile_bs,
                               vocab_size=V, num_types=T, eps=eps)

    grid_spec = pltpu.PrefetchScalarGridSpec(
        num_scalar_prefetch=1,                       # word ids -> SMEM
        grid=(BS // tile_bs,),
        in_specs=[
            pl.BlockSpec((tile_bs, 1), lambda i, ids: (i, 0)),        # token type ids
            pl.BlockSpec((tile_bs, H), lambda i, ids: (i % bps, 0)),  # position rows
            pl.BlockSpec((T, H), lambda i, ids: (0, 0)),              # token-type table
            pl.BlockSpec((1, H), lambda i, ids: (0, 0)),              # LN gamma
            pl.BlockSpec((1, H), lambda i, ids: (0, 0)),              # LN beta
            pl.BlockSpec(memory_space=pl.ANY),                        # word table (HBM)
        ],
        out_specs=pl.BlockSpec((tile_bs, H), lambda i, ids: (i, 0)),
        scratch_shapes=[
            pltpu.VMEM((tile_bs, H), jnp.float32),                    # gathered word rows
            pltpu.SemaphoreType.DMA((tile_bs,)),                      # per-row DMA sems
        ],
    )

    out_flat = pl.pallas_call(
        kernel,
        out_shape=jax.ShapeDtypeStruct((BS, H), jnp.float32),
        grid_spec=grid_spec,
        compiler_params=pltpu.CompilerParams(
            dimension_semantics=("parallel",),
            vmem_limit_bytes=16 * 1024 * 1024),
    )(ids_flat, tts_flat, pos_w32, type_w32, gamma2d, beta2d, word_w32)

    return out_flat.reshape(B, S, H)


def bert_embeddings_ref(input_ids, token_type_ids, word_w, pos_w, type_w,
                        ln_gamma, ln_beta, *, eps=1e-12):
    """Pure-JAX reference mirroring the PyTorch forward (eval-mode dropout)."""
    B, S = input_ids.shape
    V, H = word_w.shape
    P = pos_w.shape[0]
    T = type_w.shape[0]
    word_probs = jax.nn.one_hot(input_ids, V, dtype=jnp.float32)
    pos_ids = jnp.broadcast_to(jnp.arange(S)[None, :], (B, S))
    pos_probs = jax.nn.one_hot(pos_ids, P, dtype=jnp.float32)
    type_probs = jax.nn.one_hot(token_type_ids, T, dtype=jnp.float32)
    emb = (word_probs.reshape(-1, V) @ word_w
           + pos_probs.reshape(-1, P) @ pos_w
           + type_probs.reshape(-1, T) @ type_w).reshape(B, S, H)
    mean = emb.mean(-1, keepdims=True)
    var = ((emb - mean) ** 2).mean(-1, keepdims=True)
    normed = (emb - mean) / jnp.sqrt(var + eps)
    return normed * ln_gamma + ln_beta


if __name__ == "__main__":
    # Small synthetic BERT config (H kept a multiple of 128 so stores are lane-dense).
    vocab_size = 32
    max_position_embeddings = 16
    type_vocab_size = 2
    hidden_size = 128
    batch, seq = 2, 8

    key = jax.random.PRNGKey(0)
    k_ww, k_wp, k_wt, k_ids, k_tt = jax.random.split(key, 5)

    word_w = 0.02 * jax.random.normal(k_ww, (vocab_size, hidden_size), jnp.float32)
    pos_w = 0.02 * jax.random.normal(k_wp, (max_position_embeddings, hidden_size), jnp.float32)
    type_w = 0.02 * jax.random.normal(k_wt, (type_vocab_size, hidden_size), jnp.float32)
    ln_gamma = jnp.ones((hidden_size,), jnp.float32)
    ln_beta = jnp.zeros((hidden_size,), jnp.float32)

    input_ids = jax.random.randint(k_ids, (batch, seq), 0, vocab_size, dtype=jnp.int32)
    token_type_ids = jax.random.randint(k_tt, (batch, seq), 0, type_vocab_size, dtype=jnp.int32)

    out = bert_embeddings(input_ids, token_type_ids, word_w, pos_w, type_w,
                          ln_gamma, ln_beta)
    out = jax.block_until_ready(out)

    ref = bert_embeddings_ref(input_ids, token_type_ids, word_w, pos_w, type_w,
                              ln_gamma, ln_beta)
    assert out.shape == (batch, seq, hidden_size)
    assert jnp.allclose(out, ref, atol=1e-4, rtol=1e-4), "mismatch vs reference"

    print("KERNEL_OK")
</pallas_src>

<mosaic_0001>
module attributes {stable_mosaic.version = 11 : i64} {
  func.func @bert_embeddings_kernel(%arg0: i32, %arg1: memref<16xi32, #tpu.memory_space<smem>>, %arg2: memref<8x1xi32, #tpu.memory_space<vmem>>, %arg3: memref<8x128xf32, #tpu.memory_space<vmem>>, %arg4: memref<2x128xf32, #tpu.memory_space<vmem>>, %arg5: memref<1x128xf32, #tpu.memory_space<vmem>>, %arg6: memref<1x128xf32, #tpu.memory_space<vmem>>, %arg7: memref<32x128xf32, #tpu.memory_space<any>>, %arg8: memref<8x128xf32, #tpu.memory_space<vmem>>, %arg9: memref<8x128xf32, #tpu.memory_space<vmem>>, %arg10: memref<8x!tpu.dma_semaphore, #tpu.memory_space<semaphore_mem>>) attributes {dimension_semantics = [#tpu.dimension_semantics<parallel>], iteration_bounds = array<i64: 2>, scalar_prefetch = 1 : i64, scratch_operands = 2 : i64, tpu.core_type = #tpu.core_type<tc>, window_params = [{transform_indices = @transform_0, window_bounds = array<i64: 8, 1>}, {transform_indices = @transform_1, window_bounds = array<i64: 8, 128>}, {pipeline_mode = #tpu.pipeline_mode<synchronous>, transform_indices = @transform_2, window_bounds = array<i64: 2, 128>}, {pipeline_mode = #tpu.pipeline_mode<synchronous>, transform_indices = @transform_3, window_bounds = array<i64: 1, 128>}, {pipeline_mode = #tpu.pipeline_mode<synchronous>, transform_indices = @transform_4, window_bounds = array<i64: 1, 128>}, {}, {transform_indices = @transform_6, window_bounds = array<i64: 8, 128>}]} {
    %c8_i32 = arith.constant 8 : i32
    %0 = arith.muli %arg0, %c8_i32 : i32
    %c0_i32 = arith.constant 0 : i32
    %1 = arith.addi %0, %c0_i32 : i32
    %2 = arith.index_cast %1 : i32 to index
    %3 = memref.load %arg1[%2] : memref<16xi32, #tpu.memory_space<smem>>
    %c0_i32_0 = arith.constant 0 : i32
    %c31_i32 = arith.constant 31 : i32
    %4 = arith.maxsi %c0_i32_0, %3 : i32
    %5 = arith.minsi %c31_i32, %4 : i32
    %c0_i32_1 = arith.constant 0 : i32
    %c0_i32_2 = arith.constant 0 : i32
    %6 = tpu.memref_slice %arg7[%5, %c0_i32_2] : memref<32x128xf32, #tpu.memory_space<any>> -> memref<1x128xf32, #tpu.memory_space<any>>
    %c0_i32_3 = arith.constant 0 : i32
    %c0_i32_4 = arith.constant 0 : i32
    %7 = tpu.memref_slice %arg9[%c0_i32_3, %c0_i32_4] : memref<8x128xf32, #tpu.memory_space<vmem>> -> memref<1x128xf32, #tpu.memory_space<vmem>>
    %8 = tpu.memref_slice %arg10[%c0_i32_1] : memref<8x!tpu.dma_semaphore, #tpu.memory_space<semaphore_mem>> -> memref<1x!tpu.dma_semaphore, #tpu.memory_space<semaphore_mem>>
    %9 = tpu.memref_squeeze %8 : memref<1x!tpu.dma_semaphore, #tpu.memory_space<semaphore_mem>> -> memref<!tpu.dma_semaphore, #tpu.memory_space<semaphore_mem>>
    tpu.enqueue_dma source(%6 : memref<1x128xf32, #tpu.memory_space<any>>) target(%7 : memref<1x128xf32, #tpu.memory_space<vmem>>) target_semaphore(%9 : memref<!tpu.dma_semaphore, #tpu.memory_space<semaphore_mem>>)
    %c1_i32 = arith.constant 1 : i32
    %10 = arith.addi %0, %c1_i32 : i32
    %11 = arith.index_cast %10 : i32 to index
    %12 = memref.load %arg1[%11] : memref<16xi32, #tpu.memory_space<smem>>
    %c0_i32_5 = arith.constant 0 : i32
    %c31_i32_6 = arith.constant 31 : i32
    %13 = arith.maxsi %c0_i32_5, %12 : i32
    %14 = arith.minsi %c31_i32_6, %13 : i32
    %c1_i32_7 = arith.constant 1 : i32
    %c0_i32_8 = arith.constant 0 : i32
    %15 = tpu.memref_slice %arg7[%14, %c0_i32_8] : memref<32x128xf32, #tpu.memory_space<any>> -> memref<1x128xf32, #tpu.memory_space<any>>
    %c1_i32_9 = arith.constant 1 : i32
    %c0_i32_10 = arith.constant 0 : i32
    %16 = tpu.memref_slice %arg9[%c1_i32_9, %c0_i32_10] : memref<8x128xf32, #tpu.memory_space<vmem>> -> memref<1x128xf32, #tpu.memory_space<vmem>>
    %17 = tpu.memref_slice %arg10[%c1_i32_7] : memref<8x!tpu.dma_semaphore, #tpu.memory_space<semaphore_mem>> -> memref<1x!tpu.dma_semaphore, #tpu.memory_space<semaphore_mem>>
    %18 = tpu.memref_squeeze %17 : memref<1x!tpu.dma_semaphore, #tpu.memory_space<semaphore_mem>> -> memref<!tpu.dma_semaphore, #tpu.memory_space<semaphore_mem>>
    tpu.enqueue_dma source(%15 : memref<1x128xf32, #tpu.memory_space<any>>) target(%16 : memref<1x128xf32, #tpu.memory_space<vmem>>) target_semaphore(%18 : memref<!tpu.dma_semaphore, #tpu.memory_space<semaphore_mem>>)
    %c2_i32 = arith.constant 2 : i32
    %19 = arith.addi %0, %c2_i32 : i32
    %20 = arith.index_cast %19 : i32 to index
    %21 = memref.load %arg1[%20] : memref<16xi32, #tpu.memory_space<smem>>
    %c0_i32_11 = arith.constant 0 : i32
    %c31_i32_12 = arith.constant 31 : i32
    %22 = arith.maxsi %c0_i32_11, %21 : i32
    %23 = arith.minsi %c31_i32_12, %22 : i32
    %c2_i32_13 = arith.constant 2 : i32
    %c0_i32_14 = arith.constant 0 : i32
    %24 = tpu.memref_slice %arg7[%23, %c0_i32_14] : memref<32x128xf32, #tpu.memory_space<any>> -> memref<1x128xf32, #tpu.memory_space<any>>
    %c2_i32_15 = arith.constant 2 : i32
    %c0_i32_16 = arith.constant 0 : i32
    %25 = tpu.memref_slice %arg9[%c2_i32_15, %c0_i32_16] : memref<8x128xf32, #tpu.memory_space<vmem>> -> memref<1x128xf32, #tpu.memory_space<vmem>>
    %26 = tpu.memref_slice %arg10[%c2_i32_13] : memref<8x!tpu.dma_semaphore, #tpu.memory_space<semaphore_mem>> -> memref<1x!tpu.dma_semaphore, #tpu.memory_space<semaphore_mem>>
    %27 = tpu.memref_squeeze %26 : memref<1x!tpu.dma_semaphore, #tpu.memory_space<semaphore_mem>> -> memref<!tpu.dma_semaphore, #tpu.memory_space<semaphore_mem>>
    tpu.enqueue_dma source(%24 : memref<1x128xf32, #tpu.memory_space<any>>) target(%25 : memref<1x128xf32, #tpu.memory_space<vmem>>) target_semaphore(%27 : memref<!tpu.dma_semaphore, #tpu.memory_space<semaphore_mem>>)
    %c3_i32 = arith.constant 3 : i32
    %28 = arith.addi %0, %c3_i32 : i32
    %29 = arith.index_cast %28 : i32 to index
    %30 = memref.load %arg1[%29] : memref<16xi32, #tpu.memory_space<smem>>
    %c0_i32_17 = arith.constant 0 : i32
    %c31_i32_18 = arith.constant 31 : i32
    %31 = arith.maxsi %c0_i32_17, %30 : i32
    %32 = arith.minsi %c31_i32_18, %31 : i32
    %c3_i32_19 = arith.constant 3 : i32
    %c0_i32_20 = arith.constant 0 : i32
    %33 = tpu.memref_slice %arg7[%32, %c0_i32_20] : memref<32x128xf32, #tpu.memory_space<any>> -> memref<1x128xf32, #tpu.memory_space<any>>
    %c3_i32_21 = arith.constant 3 : i32
    %c0_i32_22 = arith.constant 0 : i32
    %34 = tpu.memref_slice %arg9[%c3_i32_21, %c0_i32_22] : memref<8x128xf32, #tpu.memory_space<vmem>> -> memref<1x128xf32, #tpu.memory_space<vmem>>
    %35 = tpu.memref_slice %arg10[%c3_i32_19] : memref<8x!tpu.dma_semaphore, #tpu.memory_space<semaphore_mem>> -> memref<1x!tpu.dma_semaphore, #tpu.memory_space<semaphore_mem>>
    %36 = tpu.memref_squeeze %35 : memref<1x!tpu.dma_semaphore, #tpu.memory_space<semaphore_mem>> -> memref<!tpu.dma_semaphore, #tpu.memory_space<semaphore_mem>>
    tpu.enqueue_dma source(%33 : memref<1x128xf32, #tpu.memory_space<any>>) target(%34 : memref<1x128xf32, #tpu.memory_space<vmem>>) target_semaphore(%36 : memref<!tpu.dma_semaphore, #tpu.memory_space<semaphore_mem>>)
    %c4_i32 = arith.constant 4 : i32
    %37 = arith.addi %0, %c4_i32 : i32
    %38 = arith.index_cast %37 : i32 to index
    %39 = memref.load %arg1[%38] : memref<16xi32, #tpu.memory_space<smem>>
    %c0_i32_23 = arith.constant 0 : i32
    %c31_i32_24 = arith.constant 31 : i32
    %40 = arith.maxsi %c0_i32_23, %39 : i32
    %41 = arith.minsi %c31_i32_24, %40 : i32
    %c4_i32_25 = arith.constant 4 : i32
    %c0_i32_26 = arith.constant 0 : i32
    %42 = tpu.memref_slice %arg7[%41, %c0_i32_26] : memref<32x128xf32, #tpu.memory_space<any>> -> memref<1x128xf32, #tpu.memory_space<any>>
    %c4_i32_27 = arith.constant 4 : i32
    %c0_i32_28 = arith.constant 0 : i32
    %43 = tpu.memref_slice %arg9[%c4_i32_27, %c0_i32_28] : memref<8x128xf32, #tpu.memory_space<vmem>> -> memref<1x128xf32, #tpu.memory_space<vmem>>
    %44 = tpu.memref_slice %arg10[%c4_i32_25] : memref<8x!tpu.dma_semaphore, #tpu.memory_space<semaphore_mem>> -> memref<1x!tpu.dma_semaphore, #tpu.memory_space<semaphore_mem>>
    %45 = tpu.memref_squeeze %44 : memref<1x!tpu.dma_semaphore, #tpu.memory_space<semaphore_mem>> -> memref<!tpu.dma_semaphore, #tpu.memory_space<semaphore_mem>>
    tpu.enqueue_dma source(%42 : memref<1x128xf32, #tpu.memory_space<any>>) target(%43 : memref<1x128xf32, #tpu.memory_space<vmem>>) target_semaphore(%45 : memref<!tpu.dma_semaphore, #tpu.memory_space<semaphore_mem>>)
    %c5_i32 = arith.constant 5 : i32
    %46 = arith.addi %0, %c5_i32 : i32
    %47 = arith.index_cast %46 : i32 to index
    %48 = memref.load %arg1[%47] : memref<16xi32, #tpu.memory_space<smem>>
    %c0_i32_29 = arith.constant 0 : i32
    %c31_i32_30 = arith.constant 31 : i32
    %49 = arith.maxsi %c0_i32_29, %48 : i32
    %50 = arith.minsi %c31_i32_30, %49 : i32
    %c5_i32_31 = arith.constant 5 : i32
    %c0_i32_32 = arith.constant 0 : i32
    %51 = tpu.memref_slice %arg7[%50, %c0_i32_32] : memref<32x128xf32, #tpu.memory_space<any>> -> memref<1x128xf32, #tpu.memory_space<any>>
    %c5_i32_33 = arith.constant 5 : i32
    %c0_i32_34 = arith.constant 0 : i32
    %52 = tpu.memref_slice %arg9[%c5_i32_33, %c0_i32_34] : memref<8x128xf32, #tpu.memory_space<vmem>> -> memref<1x128xf32, #tpu.memory_space<vmem>>
    %53 = tpu.memref_slice %arg10[%c5_i32_31] : memref<8x!tpu.dma_semaphore, #tpu.memory_space<semaphore_mem>> -> memref<1x!tpu.dma_semaphore, #tpu.memory_space<semaphore_mem>>
    %54 = tpu.memref_squeeze %53 : memref<1x!tpu.dma_semaphore, #tpu.memory_space<semaphore_mem>> -> memref<!tpu.dma_semaphore, #tpu.memory_space<semaphore_mem>>
    tpu.enqueue_dma source(%51 : memref<1x128xf32, #tpu.memory_space<any>>) target(%52 : memref<1x128xf32, #tpu.memory_space<vmem>>) target_semaphore(%54 : memref<!tpu.dma_semaphore, #tpu.memory_space<semaphore_mem>>)
    %c6_i32 = arith.constant 6 : i32
    %55 = arith.addi %0, %c6_i32 : i32
    %56 = arith.index_cast %55 : i32 to index
    %57 = memref.load %arg1[%56] : memref<16xi32, #tpu.memory_space<smem>>
    %c0_i32_35 = arith.constant 0 : i32
    %c31_i32_36 = arith.constant 31 : i32
    %58 = arith.maxsi %c0_i32_35, %57 : i32
    %59 = arith.minsi %c31_i32_36, %58 : i32
    %c6_i32_37 = arith.constant 6 : i32
    %c0_i32_38 = arith.constant 0 : i32
    %60 = tpu.memref_slice %arg7[%59, %c0_i32_38] : memref<32x128xf32, #tpu.memory_space<any>> -> memref<1x128xf32, #tpu.memory_space<any>>
    %c6_i32_39 = arith.constant 6 : i32
    %c0_i32_40 = arith.constant 0 : i32
    %61 = tpu.memref_slice %arg9[%c6_i32_39, %c0_i32_40] : memref<8x128xf32, #tpu.memory_space<vmem>> -> memref<1x128xf32, #tpu.memory_space<vmem>>
    %62 = tpu.memref_slice %arg10[%c6_i32_37] : memref<8x!tpu.dma_semaphore, #tpu.memory_space<semaphore_mem>> -> memref<1x!tpu.dma_semaphore, #tpu.memory_space<semaphore_mem>>
    %63 = tpu.memref_squeeze %62 : memref<1x!tpu.dma_semaphore, #tpu.memory_space<semaphore_mem>> -> memref<!tpu.dma_semaphore, #tpu.memory_space<semaphore_mem>>
    tpu.enqueue_dma source(%60 : memref<1x128xf32, #tpu.memory_space<any>>) target(%61 : memref<1x128xf32, #tpu.memory_space<vmem>>) target_semaphore(%63 : memref<!tpu.dma_semaphore, #tpu.memory_space<semaphore_mem>>)
    %c7_i32 = arith.constant 7 : i32
    %64 = arith.addi %0, %c7_i32 : i32
    %65 = arith.index_cast %64 : i32 to index
    %66 = memref.load %arg1[%65] : memref<16xi32, #tpu.memory_space<smem>>
    %c0_i32_41 = arith.constant 0 : i32
    %c31_i32_42 = arith.constant 31 : i32
    %67 = arith.maxsi %c0_i32_41, %66 : i32
    %68 = arith.minsi %c31_i32_42, %67 : i32
    %c7_i32_43 = arith.constant 7 : i32
    %c0_i32_44 = arith.constant 0 : i32
    %69 = tpu.memref_slice %arg7[%68, %c0_i32_44] : memref<32x128xf32, #tpu.memory_space<any>> -> memref<1x128xf32, #tpu.memory_space<any>>
    %c7_i32_45 = arith.constant 7 : i32
    %c0_i32_46 = arith.constant 0 : i32
    %70 = tpu.memref_slice %arg9[%c7_i32_45, %c0_i32_46] : memref<8x128xf32, #tpu.memory_space<vmem>> -> memref<1x128xf32, #tpu.memory_space<vmem>>
    %71 = tpu.memref_slice %arg10[%c7_i32_43] : memref<8x!tpu.dma_semaphore, #tpu.memory_space<semaphore_mem>> -> memref<1x!tpu.dma_semaphore, #tpu.memory_space<semaphore_mem>>
    %72 = tpu.memref_squeeze %71 : memref<1x!tpu.dma_semaphore, #tpu.memory_space<semaphore_mem>> -> memref<!tpu.dma_semaphore, #tpu.memory_space<semaphore_mem>>
    tpu.enqueue_dma source(%69 : memref<1x128xf32, #tpu.memory_space<any>>) target(%70 : memref<1x128xf32, #tpu.memory_space<vmem>>) target_semaphore(%72 : memref<!tpu.dma_semaphore, #tpu.memory_space<semaphore_mem>>)
    %c0_i32_47 = arith.constant 0 : i32
    %c0_i32_48 = arith.constant 0 : i32
    %73 = tpu.memref_slice %arg7[%5, %c0_i32_48] : memref<32x128xf32, #tpu.memory_space<any>> -> memref<1x128xf32, #tpu.memory_space<any>>
    %c0_i32_49 = arith.constant 0 : i32
    %c0_i32_50 = arith.constant 0 : i32
    %74 = tpu.memref_slice %arg9[%c0_i32_49, %c0_i32_50] : memref<8x128xf32, #tpu.memory_space<vmem>> -> memref<1x128xf32, #tpu.memory_space<vmem>>
    %75 = tpu.memref_slice %arg10[%c0_i32_47] : memref<8x!tpu.dma_semaphore, #tpu.memory_space<semaphore_mem>> -> memref<1x!tpu.dma_semaphore, #tpu.memory_space<semaphore_mem>>
    %76 = tpu.memref_squeeze %75 : memref<1x!tpu.dma_semaphore, #tpu.memory_space<semaphore_mem>> -> memref<!tpu.dma_semaphore, #tpu.memory_space<semaphore_mem>>
    tpu.wait_dma2 semaphore(%76 : memref<!tpu.dma_semaphore, #tpu.memory_space<semaphore_mem>>) src(%73 : memref<1x128xf32, #tpu.memory_space<any>>) dst(%74 : memref<1x128xf32, #tpu.memory_space<vmem>>)
    %c1_i32_51 = arith.constant 1 : i32
    %c0_i32_52 = arith.constant 0 : i32
    %77 = tpu.memref_slice %arg7[%14, %c0_i32_52] : memref<32x128xf32, #tpu.memory_space<any>> -> memref<1x128xf32, #tpu.memory_space<any>>
    %c1_i32_53 = arith.constant 1 : i32
    %c0_i32_54 = arith.constant 0 : i32
    %78 = tpu.memref_slice %arg9[%c1_i32_53, %c0_i32_54] : memref<8x128xf32, #tpu.memory_space<vmem>> -> memref<1x128xf32, #tpu.memory_space<vmem>>
    %79 = tpu.memref_slice %arg10[%c1_i32_51] : memref<8x!tpu.dma_semaphore, #tpu.memory_space<semaphore_mem>> -> memref<1x!tpu.dma_semaphore, #tpu.memory_space<semaphore_mem>>
    %80 = tpu.memref_squeeze %79 : memref<1x!tpu.dma_semaphore, #tpu.memory_space<semaphore_mem>> -> memref<!tpu.dma_semaphore, #tpu.memory_space<semaphore_mem>>
    tpu.wait_dma2 semaphore(%80 : memref<!tpu.dma_semaphore, #tpu.memory_space<semaphore_mem>>) src(%77 : memref<1x128xf32, #tpu.memory_space<any>>) dst(%78 : memref<1x128xf32, #tpu.memory_space<vmem>>)
    %c2_i32_55 = arith.constant 2 : i32
    %c0_i32_56 = arith.constant 0 : i32
    %81 = tpu.memref_slice %arg7[%23, %c0_i32_56] : memref<32x128xf32, #tpu.memory_space<any>> -> memref<1x128xf32, #tpu.memory_space<any>>
    %c2_i32_57 = arith.constant 2 : i32
    %c0_i32_58 = arith.constant 0 : i32
    %82 = tpu.memref_slice %arg9[%c2_i32_57, %c0_i32_58] : memref<8x128xf32, #tpu.memory_space<vmem>> -> memref<1x128xf32, #tpu.memory_space<vmem>>
    %83 = tpu.memref_slice %arg10[%c2_i32_55] : memref<8x!tpu.dma_semaphore, #tpu.memory_space<semaphore_mem>> -> memref<1x!tpu.dma_semaphore, #tpu.memory_space<semaphore_mem>>
    %84 = tpu.memref_squeeze %83 : memref<1x!tpu.dma_semaphore, #tpu.memory_space<semaphore_mem>> -> memref<!tpu.dma_semaphore, #tpu.memory_space<semaphore_mem>>
    tpu.wait_dma2 semaphore(%84 : memref<!tpu.dma_semaphore, #tpu.memory_space<semaphore_mem>>) src(%81 : memref<1x128xf32, #tpu.memory_space<any>>) dst(%82 : memref<1x128xf32, #tpu.memory_space<vmem>>)
    %c3_i32_59 = arith.constant 3 : i32
    %c0_i32_60 = arith.constant 0 : i32
    %85 = tpu.memref_slice %arg7[%32, %c0_i32_60] : memref<32x128xf32, #tpu.memory_space<any>> -> memref<1x128xf32, #tpu.memory_space<any>>
    %c3_i32_61 = arith.constant 3 : i32
    %c0_i32_62 = arith.constant 0 : i32
    %86 = tpu.memref_slice %arg9[%c3_i32_61, %c0_i32_62] : memref<8x128xf32, #tpu.memory_space<vmem>> -> memref<1x128xf32, #tpu.memory_space<vmem>>
    %87 = tpu.memref_slice %arg10[%c3_i32_59] : memref<8x!tpu.dma_semaphore, #tpu.memory_space<semaphore_mem>> -> memref<1x!tpu.dma_semaphore, #tpu.memory_space<semaphore_mem>>
    %88 = tpu.memref_squeeze %87 : memref<1x!tpu.dma_semaphore, #tpu.memory_space<semaphore_mem>> -> memref<!tpu.dma_semaphore, #tpu.memory_space<semaphore_mem>>
    tpu.wait_dma2 semaphore(%88 : memref<!tpu.dma_semaphore, #tpu.memory_space<semaphore_mem>>) src(%85 : memref<1x128xf32, #tpu.memory_space<any>>) dst(%86 : memref<1x128xf32, #tpu.memory_space<vmem>>)
    %c4_i32_63 = arith.constant 4 : i32
    %c0_i32_64 = arith.constant 0 : i32
    %89 = tpu.memref_slice %arg7[%41, %c0_i32_64] : memref<32x128xf32, #tpu.memory_space<any>> -> memref<1x128xf32, #tpu.memory_space<any>>
    %c4_i32_65 = arith.constant 4 : i32
    %c0_i32_66 = arith.constant 0 : i32
    %90 = tpu.memref_slice %arg9[%c4_i32_65, %c0_i32_66] : memref<8x128xf32, #tpu.memory_space<vmem>> -> memref<1x128xf32, #tpu.memory_space<vmem>>
    %91 = tpu.memref_slice %arg10[%c4_i32_63] : memref<8x!tpu.dma_semaphore, #tpu.memory_space<semaphore_mem>> -> memref<1x!tpu.dma_semaphore, #tpu.memory_space<semaphore_mem>>
    %92 = tpu.memref_squeeze %91 : memref<1x!tpu.dma_semaphore, #tpu.memory_space<semaphore_mem>> -> memref<!tpu.dma_semaphore, #tpu.memory_space<semaphore_mem>>
    tpu.wait_dma2 semaphore(%92 : memref<!tpu.dma_semaphore, #tpu.memory_space<semaphore_mem>>) src(%89 : memref<1x128xf32, #tpu.memory_space<any>>) dst(%90 : memref<1x128xf32, #tpu.memory_space<vmem>>)
    %c5_i32_67 = arith.constant 5 : i32
    %c0_i32_68 = arith.constant 0 : i32
    %93 = tpu.memref_slice %arg7[%50, %c0_i32_68] : memref<32x128xf32, #tpu.memory_space<any>> -> memref<1x128xf32, #tpu.memory_space<any>>
    %c5_i32_69 = arith.constant 5 : i32
    %c0_i32_70 = arith.constant 0 : i32
    %94 = tpu.memref_slice %arg9[%c5_i32_69, %c0_i32_70] : memref<8x128xf32, #tpu.memory_space<vmem>> -> memref<1x128xf32, #tpu.memory_space<vmem>>
    %95 = tpu.memref_slice %arg10[%c5_i32_67] : memref<8x!tpu.dma_semaphore, #tpu.memory_space<semaphore_mem>> -> memref<1x!tpu.dma_semaphore, #tpu.memory_space<semaphore_mem>>
    %96 = tpu.memref_squeeze %95 : memref<1x!tpu.dma_semaphore, #tpu.memory_space<semaphore_mem>> -> memref<!tpu.dma_semaphore, #tpu.memory_space<semaphore_mem>>
    tpu.wait_dma2 semaphore(%96 : memref<!tpu.dma_semaphore, #tpu.memory_space<semaphore_mem>>) src(%93 : memref<1x128xf32, #tpu.memory_space<any>>) dst(%94 : memref<1x128xf32, #tpu.memory_space<vmem>>)
    %c6_i32_71 = arith.constant 6 : i32
    %c0_i32_72 = arith.constant 0 : i32
    %97 = tpu.memref_slice %arg7[%59, %c0_i32_72] : memref<32x128xf32, #tpu.memory_space<any>> -> memref<1x128xf32, #tpu.memory_space<any>>
    %c6_i32_73 = arith.constant 6 : i32
    %c0_i32_74 = arith.constant 0 : i32
    %98 = tpu.memref_slice %arg9[%c6_i32_73, %c0_i32_74] : memref<8x128xf32, #tpu.memory_space<vmem>> -> memref<1x128xf32, #tpu.memory_space<vmem>>
    %99 = tpu.memref_slice %arg10[%c6_i32_71] : memref<8x!tpu.dma_semaphore, #tpu.memory_space<semaphore_mem>> -> memref<1x!tpu.dma_semaphore, #tpu.memory_space<semaphore_mem>>
    %100 = tpu.memref_squeeze %99 : memref<1x!tpu.dma_semaphore, #tpu.memory_space<semaphore_mem>> -> memref<!tpu.dma_semaphore, #tpu.memory_space<semaphore_mem>>
    tpu.wait_dma2 semaphore(%100 : memref<!tpu.dma_semaphore, #tpu.memory_space<semaphore_mem>>) src(%97 : memref<1x128xf32, #tpu.memory_space<any>>) dst(%98 : memref<1x128xf32, #tpu.memory_space<vmem>>)
    %c7_i32_75 = arith.constant 7 : i32
    %c0_i32_76 = arith.constant 0 : i32
    %101 = tpu.memref_slice %arg7[%68, %c0_i32_76] : memref<32x128xf32, #tpu.memory_space<any>> -> memref<1x128xf32, #tpu.memory_space<any>>
    %c7_i32_77 = arith.constant 7 : i32
    %c0_i32_78 = arith.constant 0 : i32
    %102 = tpu.memref_slice %arg9[%c7_i32_77, %c0_i32_78] : memref<8x128xf32, #tpu.memory_space<vmem>> -> memref<1x128xf32, #tpu.memory_space<vmem>>
    %103 = tpu.memref_slice %arg10[%c7_i32_75] : memref<8x!tpu.dma_semaphore, #tpu.memory_space<semaphore_mem>> -> memref<1x!tpu.dma_semaphore, #tpu.memory_space<semaphore_mem>>
    %104 = tpu.memref_squeeze %103 : memref<1x!tpu.dma_semaphore, #tpu.memory_space<semaphore_mem>> -> memref<!tpu.dma_semaphore, #tpu.memory_space<semaphore_mem>>
    tpu.wait_dma2 semaphore(%104 : memref<!tpu.dma_semaphore, #tpu.memory_space<semaphore_mem>>) src(%101 : memref<1x128xf32, #tpu.memory_space<any>>) dst(%102 : memref<1x128xf32, #tpu.memory_space<vmem>>)
    %c0 = arith.constant 0 : index
    %c0_79 = arith.constant 0 : index
    %105 = vector.load %arg9[%c0, %c0_79] : memref<8x128xf32, #tpu.memory_space<vmem>>, vector<8x128xf32>
    %c0_80 = arith.constant 0 : index
    %c0_81 = arith.constant 0 : index
    %106 = vector.load %arg2[%c0_80, %c0_81] : memref<8x1xi32, #tpu.memory_space<vmem>>, vector<8x1xi32>
    %cst = arith.constant 0.000000e+00 : f32
    %107 = vector.broadcast %cst : f32 to vector<8x128xf32>
    %c0_i32_82 = arith.constant 0 : i32
    %108 = vector.broadcast %c0_i32_82 : i32 to vector<8x1xi32>
    %109 = arith.cmpi eq, %106, %108 : vector<8x1xi32>
    %cst_83 = arith.constant 1.000000e+00 : f32
    %cst_84 = arith.constant 0.000000e+00 : f32
    %110 = vector.broadcast %cst_83 : f32 to vector<8x1xf32>
    %111 = vector.broadcast %cst_84 : f32 to vector<8x1xf32>
    %112 = arith.select %109, %110, %111 : vector<8x1xi1>, vector<8x1xf32>
    %c0_85 = arith.constant 0 : index
    %c0_86 = arith.constant 0 : index
    %113 = vector.load %arg4[%c0_85, %c0_86] : memref<2x128xf32, #tpu.memory_space<vmem>>, vector<1x128xf32>
    %114 = vector.broadcast %112 : vector<8x1xf32> to vector<8x128xf32>
    %115 = vector.broadcast %113 : vector<1x128xf32> to vector<8x128xf32>
    %116 = arith.mulf %114, %115 : vector<8x128xf32>
    %117 = arith.addf %107, %116 : vector<8x128xf32>
    %c1_i32_87 = arith.constant 1 : i32
    %118 = vector.broadcast %c1_i32_87 : i32 to vector<8x1xi32>
    %119 = arith.cmpi eq, %106, %118 : vector<8x1xi32>
    %cst_88 = arith.constant 1.000000e+00 : f32
    %cst_89 = arith.constant 0.000000e+00 : f32
    %120 = vector.broadcast %cst_88 : f32 to vector<8x1xf32>
    %121 = vector.broadcast %cst_89 : f32 to vector<8x1xf32>
    %122 = arith.select %119, %120, %121 : vector<8x1xi1>, vector<8x1xf32>
    %c1 = arith.constant 1 : index
    %c0_90 = arith.constant 0 : index
    %123 = vector.load %arg4[%c1, %c0_90] : memref<2x128xf32, #tpu.memory_space<vmem>>, vector<1x128xf32>
    %124 = vector.broadcast %122 : vector<8x1xf32> to vector<8x128xf32>
    %125 = vector.broadcast %123 : vector<1x128xf32> to vector<8x128xf32>
    %126 = arith.mulf %124, %125 : vector<8x128xf32>
    %127 = arith.addf %117, %126 : vector<8x128xf32>
    %c0_91 = arith.constant 0 : index
    %c0_92 = arith.constant 0 : index
    %128 = vector.load %arg3[%c0_91, %c0_92] : memref<8x128xf32, #tpu.memory_space<vmem>>, vector<8x128xf32>
    %129 = arith.addf %105, %128 : vector<8x128xf32>
    %130 = arith.addf %129, %127 : vector<8x128xf32>
    %cst_93 = arith.constant dense<0.000000e+00> : vector<8xf32>
    %131 = vector.multi_reduction <add>, %130, %cst_93 [1] : vector<8x128xf32> to vector<8xf32>
    %132 = vector.shape_cast %131 : vector<8xf32> to vector<8x1xf32>
    %cst_94 = arith.constant 1.280000e+02 : f32
    %133 = vector.broadcast %cst_94 : f32 to vector<8x1xf32>
    %134 = arith.divf %132, %133 : vector<8x1xf32>
    %135 = vector.broadcast %134 : vector<8x1xf32> to vector<8x128xf32>
    %136 = arith.subf %130, %135 : vector<8x128xf32>
    %137 = arith.mulf %136, %136 : vector<8x128xf32>
    %cst_95 = arith.constant dense<0.000000e+00> : vector<8xf32>
    %138 = vector.multi_reduction <add>, %137, %cst_95 [1] : vector<8x128xf32> to vector<8xf32>
    %139 = vector.shape_cast %138 : vector<8xf32> to vector<8x1xf32>
    %cst_96 = arith.constant 1.280000e+02 : f32
    %140 = vector.broadcast %cst_96 : f32 to vector<8x1xf32>
    %141 = arith.divf %139, %140 : vector<8x1xf32>
    %cst_97 = arith.constant 9.99999996E-13 : f32
    %142 = vector.broadcast %cst_97 : f32 to vector<8x1xf32>
    %143 = arith.addf %141, %142 : vector<8x1xf32>
    %144 = math.rsqrt %143 : vector<8x1xf32>
    %145 = vector.broadcast %144 : vector<8x1xf32> to vector<8x128xf32>
    %146 = arith.mulf %136, %145 : vector<8x128xf32>
    %c0_98 = arith.constant 0 : index
    %c0_99 = arith.constant 0 : index
    %147 = vector.load %arg5[%c0_98, %c0_99] : memref<1x128xf32, #tpu.memory_space<vmem>>, vector<1x128xf32>
    %148 = vector.broadcast %147 : vector<1x128xf32> to vector<8x128xf32>
    %149 = arith.mulf %146, %148 : vector<8x128xf32>
    %c0_100 = arith.constant 0 : index
    %c0_101 = arith.constant 0 : index
    %150 = vector.load %arg6[%c0_100, %c0_101] : memref<1x128xf32, #tpu.memory_space<vmem>>, vector<1x128xf32>
    %151 = vector.broadcast %150 : vector<1x128xf32> to vector<8x128xf32>
    %152 = arith.addf %149, %151 : vector<8x128xf32>
    %c0_102 = arith.constant 0 : index
    %c0_103 = arith.constant 0 : index
    %153 = vector.load %arg8[%c0_102, %c0_103] : memref<8x128xf32, #tpu.memory_space<vmem>>, vector<8x128xf32>
    tpu.vector_store %arg8[%c0_102, %c0_103], %152 {strides = array<i32>} : memref<8x128xf32, #tpu.memory_space<vmem>>, vector<8x128xf32>,
    return
  }
  func.func @transform_0(%arg0: i32, %arg1: memref<16xi32, #tpu.memory_space<smem>>) -> (i32, i32) {
    %c0_i32 = arith.constant 0 : i32
    %c0_i32_0 = arith.constant 0 : i32
    return %arg0, %c0_i32 : i32, i32
  }
  func.func @transform_1(%arg0: i32, %arg1: memref<16xi32, #tpu.memory_space<smem>>) -> (i32, i32) {
    %c1_i32 = arith.constant 1 : i32
    %c0_i32 = arith.constant 0 : i32
    %0 = arith.cmpi eq, %c1_i32, %c0_i32 : i32
    %c1_i32_0 = arith.constant 1 : i32
    %1 = arith.select %0, %c1_i32_0, %c1_i32 : i32
    %2 = arith.remsi %arg0, %1 : i32
    %c0_i32_1 = arith.constant 0 : i32
    %3 = arith.cmpi ne, %2, %c0_i32_1 : i32
    %c0_i32_2 = arith.constant 0 : i32
    %4 = arith.cmpi slt, %2, %c0_i32_2 : i32
    %c0_i32_3 = arith.constant 0 : i32
    %5 = arith.cmpi slt, %1, %c0_i32_3 : i32
    %6 = arith.xori %4, %5 : i1
    %7 = arith.andi %6, %3 : i1
    %8 = arith.addi %2, %1 : i32
    %9 = arith.select %7, %8, %2 : i32
    %c0_i32_4 = arith.constant 0 : i32
    %c0_i32_5 = arith.constant 0 : i32
    return %9, %c0_i32_4 : i32, i32
  }
  func.func @transform_2(%arg0: i32, %arg1: memref<16xi32, #tpu.memory_space<smem>>) -> (i32, i32) {
    %c0_i32 = arith.constant 0 : i32
    %c0_i32_0 = arith.constant 0 : i32
    %c0_i32_1 = arith.constant 0 : i32
    return %c0_i32, %c0_i32_0 : i32, i32
  }
  func.func @transform_3(%arg0: i32, %arg1: memref<16xi32, #tpu.memory_space<smem>>) -> (i32, i32) {
    %c0_i32 = arith.constant 0 : i32
    %c0_i32_0 = arith.constant 0 : i32
    %c0_i32_1 = arith.constant 0 : i32
    return %c0_i32, %c0_i32_0 : i32, i32
  }
  func.func @transform_4(%arg0: i32, %arg1: memref<16xi32, #tpu.memory_space<smem>>) -> (i32, i32) {
    %c0_i32 = arith.constant 0 : i32
    %c0_i32_0 = arith.constant 0 : i32
    %c0_i32_1 = arith.constant 0 : i32
    return %c0_i32, %c0_i32_0 : i32, i32
  }
  func.func @transform_6(%arg0: i32, %arg1: memref<16xi32, #tpu.memory_space<smem>>) -> (i32, i32) {
    %c0_i32 = arith.constant 0 : i32
    %c0_i32_0 = arith.constant 0 : i32
    return %arg0, %c0_i32 : i32, i32
  }
}

</mosaic_0001>

<bundles_post_ra>
// kernel: tpu_custom_call.1
= control target key start
LH: loop header
LB: loop body
LE: loop exit
PB: predicated region body
PF: predicated region fallthrough
CT: control target
= control target key end

     0   :  { %s1050_s27 = smov [#allocation5]   ;;  %s1336_s0 = inlined_call_operand.hbm [shape: s32[16], index: 0, kind: input, shape index: {}]   ;;  %s1337_s1 = inlined_call_operand.vmem [shape: s32[16,1], index: 1, kind: input, shape index: {}]   ;;  %s1338_s2 = inlined_call_operand.vmem [shape: f32[16,128], index: 2, kind: input, shape index: {}]   ;;  %s1339_s3 = inlined_call_operand.vmem [shape: f32[2,128], index: 3, kind: input, shape index: {}]   ;;  %s1340_s4 = inlined_call_operand.vmem [shape: f32[1,128], index: 4, kind: input, shape index: {}]   ;;  %s1341_s5 = inlined_call_operand.vmem [shape: f32[1,128], index: 5, kind: input, shape index: {}]   ;;  %s1342_s6 = inlined_call_operand.hbm [shape: f32[32,128], index: 6, kind: input, shape index: {}]   ;;  %s1343_s7 = inlined_call_operand.hbm [shape: f32[16,128], index: 7, kind: output, shape index: {}]  }
   0x1   :  { %1349 = sst [smem:[#allocation40_spill]] %s1337_s1  ;;  %s13_s26 = sshll.u32 %s1336_s0, 4  ;;  %s14_s26 = int_to_ptr.hbm [resolvable:$true] %s13_s26 }
   0x2   :  { %16 = dma.hbm_to_smem %s14_s26, 16, %s1050_s27, [#allocation4] }
   0x3   :  { %1012 = dma.done.wait [#allocation4], 16 }
   0x4   :  { %1013 = vsyncadd [#allocation4], 4294967280 }
   0x5   :  { %19 = sfence }
   0x6   :  { %20 = vsyncpa [#allocation7], 0 }
   0x7   :  { %22 = vsyncpa [#allocation7 + $0x1], 0  ;;  %s1105_s28 = smov 0   ;;  %s1107_s29 = smov 0  }
   0x8   :  { %s1109_s30 = smov 0   ;;  %s1111_s8 = smov 0  }
   0x9 LB: > { %1350 = sst [smem:[#allocation36_spill]] %s1044_s30  ;;  %s623_s0 = sadd.s32 4294967295, %s1048_s8   ;;  %s1048_s8 = sphi %s1111_s8, %s1360_s8   ;;  %s1044_s30 = sphi %s1109_s30, %s1362_s30   ;;  %s1040_s29 = sphi %s1107_s29, %s1364_s29   ;;  %s1036_s28 = sphi %s1105_s28, %s1363_s28  }
   0xa   : > { %s624_s9 = sadd.s32 4294967294, %s1048_s8   ;;  %s1128_s10 = sadd.s32 1, %s1048_s8  }
   0xb   : > { %1351 = sst [smem:[#allocation37_spill]] %s1128_s10  ;;  %s145_s11 = sadd.s32 1, %s1044_s30 }
   0xc   : > { %s142_s12 = ssub.s32 %s1048_s8, %s1128_s10  ;;  %p155_p0 = scmp.ne.s32.totalorder %s1044_s30, %s1040_s29 }
   0xd   : > { %p143_p1 = scmp.eq.s32.totalorder %s142_s12, 0  ;;  %p156_p2 = scmp.eq.s32.totalorder %s623_s0, 1 }
   0xe   : > { %p161_p3 = scmp.ne.s32.totalorder %s1040_s29, %s1036_s28  ;;  %p162_p4 = scmp.eq.s32.totalorder %s624_s9, 1 }
   0xf   : > { %s1138_s13 = scalar_select %p143_p1, %s1044_s30, %s145_s11  }
  0x10   : > { %p1140_p5 = por %p156_p2, %p155_p0  ;;  %p1144_p6 = por %p162_p4, %p161_p3 }
  0x11   : > { %1352 = sst [smem:[#allocation38_spill]] %s1138_s13  ;;  %p627_p7 = scmp.ge.s32.totalorder %s1048_s8, 1 }
  0x12   : > { %p199_p8 = scmp.lt.s32.totalorder %s1048_s8, 3 }
  0x14   : > { %p200_p9 = pnand %p627_p7, %p199_p8 }
  0x16   : > { %203 = sbr.rel (%p200_p9) target bundleno = 570 (0x23a), region = 40 }
  0x1b   : > { %s1344_s16 = sand.u32 1, %s1040_s29   ;;  %p226_p10 = scmp.lt.s32.totalorder %s623_s0, 1 }
  0x1c   : > { %s1153_s17 = sshll.u32 %s1344_s16, 3  ;;  %s1155_s18 = sshll.u32 %s623_s0, 3 }
  0x1d   : > { %s231_s19 = sld [smem:[#allocation5 + %s1155_s18]]  ;;  %s1366_s0 = smov (!%p226_p10, %s623_s0), 1 }
  0x1e   : > { %s250_s20 = sadd.s32 1, %s1155_s18  ;;  %s629_s21 = sshll.u32 %s1366_s0, 3 }
  0x1f   : > { %s1355_s1 = sld [smem:[#allocation40_spill]]  ;;  %s1051_s25 = smov [#allocation2]  }
  0x20   : > { %s246_s26 = sshll.u32 %s1051_s25, 4  ;;  %s1164_s27 = sld [smem:[#allocation5 + %s250_s20]]  ;;  %s247_s26 = int_to_ptr.vmem [resolvable:$true] %s246_s26 }
  0x21   : > { %s1052_s9 = smov [#allocation2 + $0x1]   ;;  %s272_s12 = sadd.s32 2, %s1155_s18 }
  0x22   : > { %s1166_s11 = sshll.u32 %s1052_s9, 4  ;;  %s1169_s0 = sld [smem:[#allocation5 + %s272_s12]] }
  0x23   : > { %p232_p11 = scmp.gt.s32.totalorder %s231_s19, 0  ;;  %p631_p12 = scmp.lt.s32.totalorder %s231_s19, 31 }
  0x24   : > { %1356 = sst [smem:[#allocation39_spill]] %s1166_s11  ;;  %s1180_s12 = scalar_lea.hbm %s1342_s6, 32 }
  0x25   : > { %s1162_s24 = scalar_lea.vmem %s1355_s1, %s629_s21  ;;  %s1368_s19 = smov (!%p232_p11, %s231_s19), 0 }
  0x26   : > { %s1370_s19 = smov (!%p631_p12, %s1368_s19), 31  ;;  %p252_p13 = scmp.gt.s32.totalorder %s1164_s27, 0 }
  0x27   : > { %s236_s20 = scalar_lea.hbm %s1342_s6, %s1370_s19  ;;  %p636_p0 = scmp.lt.s32.totalorder %s1164_s27, 31 }
  0x28   : > { %s244_s23 = sshll.u32 %s236_s20, 4  ;;  %s245_s23 = int_to_ptr.hbm [resolvable:$true] %s244_s23 }
  0x29   : > { %s776_s25 = sshra.s32 %s245_s23, 4  ;;  %s777_s25 = int_to_ptr.hbm [resolvable:$true] %s776_s25 }
  0x2a   : > { %s778_s9 = scalar_lea.hbm %s777_s25, 1  ;;  %p781_p2 = scmp.lt.s32.totalorder %s777_s25, %s1342_s6 }
  0x2b   : > { %p779_p1 = scmp.ne.s32.totalorder %s777_s25, %s778_s9  ;;  %p782_p3 = scmp.lt.s32.totalorder %s1180_s12, %s778_s9 }
  0x2d   : > { %p783_p4 = por %p782_p3, %p781_p2 }
  0x2f   : > { %p784_p7 = pnand %p783_p4, %p779_p1 }
  0x31   : > { %787 = shalt.err (!%p784_p7)  }
  0x32   : > { %249 = dma.hbm_to_vmem [thread:$0]  %s245_s23, 16, %s247_s26, [#allocation3] }
  0x33   : > { %s253_s1 = scalar_select %p252_p13, %s1164_s27, 0 }
  0x34   : > { %p274_p8 = scmp.gt.s32.totalorder %s1169_s0, 0  ;;  %p641_p9 = scmp.lt.s32.totalorder %s1169_s0, 31 }
  0x35   : > { %s1372_s1 = smov (!%p636_p0, %s253_s1), 31  ;;  %s294_s26 = sadd.s32 3, %s1155_s18 }
  0x36   : > { %s275_s30 = scalar_select %p274_p8, %s1169_s0, 0 }
  0x37   : > { %s256_s19 = scalar_lea.hbm %s1342_s6, %s1372_s1  ;;  %s1198_s22 = sld [smem:[#allocation5 + %s294_s26]] }
  0x38   : > { %s266_s21 = sshll.u32 %s256_s19, 4  ;;  %s1053_s20 = smov [#allocation2 + $0x2]   ;;  %s267_s21 = int_to_ptr.hbm [resolvable:$true] %s266_s21 }
  0x39   : > { %s1200_s23 = sshll.u32 %s1053_s20, 4  ;;  %s800_s25 = sshra.s32 %s267_s21, 4  ;;  %s801_s25 = int_to_ptr.hbm [resolvable:$true] %s800_s25  ;;  %s291_s23 = int_to_ptr.vmem [resolvable:$true] %s1200_s23 }
  0x3a   : > { %s802_s9 = scalar_lea.hbm %s801_s25, 1  ;;  %p805_p11 = scmp.lt.s32.totalorder %s801_s25, %s1342_s6 }
  0x3b   : > { %p803_p10 = scmp.ne.s32.totalorder %s801_s25, %s802_s9  ;;  %p806_p12 = scmp.lt.s32.totalorder %s1180_s12, %s802_s9 }
  0x3d   : > { %p807_p13 = por %p806_p12, %p805_p11 }
  0x3f   : > { %p808_p0 = pnand %p807_p13, %p803_p10 }
  0x41   : > { %811 = shalt.err (!%p808_p0)  }
  0x42   : > { %s1357_s1 = sld [smem:[#allocation39_spill]]  ;;  %s1374_s30 = smov (!%p641_p9, %s275_s30), 31 }
  0x43   : > { %s278_s11 = scalar_lea.hbm %s1342_s6, %s1374_s30  ;;  %s316_s26 = sadd.s32 4, %s1155_s18 }
  0x44   : > { %s288_s20 = sshll.u32 %s278_s11, 4  ;;  %p296_p1 = scmp.gt.s32.totalorder %s1198_s22, 0  ;;  %s289_s20 = int_to_ptr.hbm [resolvable:$true] %s288_s20 }
  0x45   : > { %p646_p2 = scmp.lt.s32.totalorder %s1198_s22, 31  ;;  %s824_s25 = sshra.s32 %s289_s20, 4  ;;  %s825_s25 = int_to_ptr.hbm [resolvable:$true] %s824_s25 }
  0x46   : > { %s826_s9 = scalar_lea.hbm %s825_s25, 1  ;;  %p829_p4 = scmp.lt.s32.totalorder %s825_s25, %s1342_s6 }
  0x47   : > { %p827_p3 = scmp.ne.s32.totalorder %s825_s25, %s826_s9  ;;  %p830_p7 = scmp.lt.s32.totalorder %s1180_s12, %s826_s9 }
  0x48   : > { %s1358_s13 = int_to_ptr.vmem [resolvable:$true] %s1357_s1 }
  0x49   : > { %271 = dma.hbm_to_vmem [thread:$0]  %s267_s21, 16, %s1358_s13, [#allocation3 + $0x1] }
  0x4a   : > { %p831_p8 = por %p830_p7, %p829_p4 }
  0x4c   : > { %p832_p9 = pnand %p831_p8, %p827_p3 }
  0x4e   : > { %835 = shalt.err (!%p832_p9)  }
  0x4f   : > { %293 = dma.hbm_to_vmem [thread:$0]  %s289_s20, 16, %s291_s23, [#allocation3 + $0x2] }
  0x50   : > { %s297_s0 = scalar_select %p296_p1, %s1198_s22, 0 }
  0x51   : > { %s1054_s30 = smov [#allocation2 + $0x3]   ;;  %s317_s13 = sld [smem:[#allocation5 + %s316_s26]] }
  0x52   : > { %s312_s21 = sshll.u32 %s1054_s30, 4  ;;  %s1376_s0 = smov (!%p646_p2, %s297_s0), 31  ;;  %s313_s21 = int_to_ptr.vmem [resolvable:$true] %s312_s21 }
  0x53   : > { %s338_s16 = sadd.s32 5, %s1155_s18  ;;  %s300_s25 = scalar_lea.hbm %s1342_s6, %s1376_s0 }
  0x54   : > { %s310_s9 = sshll.u32 %s300_s25, 4  ;;  %s1228_s27 = sld [smem:[#allocation5 + %s338_s16]]  ;;  %s311_s9 = int_to_ptr.hbm [resolvable:$true] %s310_s9 }
  0x55   : > { %s1055_s23 = smov [#allocation2 + $0x4]   ;;  %s848_s1 = sshra.s32 %s311_s9, 4  ;;  %s849_s1 = int_to_ptr.hbm [resolvable:$true] %s848_s1 }
  0x56   : > { %s1230_s20 = sshll.u32 %s1055_s23, 4  ;;  %s850_s30 = scalar_lea.hbm %s849_s1, 1  ;;  %s335_s20 = int_to_ptr.vmem [resolvable:$true] %s1230_s20 }
  0x57   : > { %p851_p10 = scmp.ne.s32.totalorder %s849_s1, %s850_s30  ;;  %p853_p11 = scmp.lt.s32.totalorder %s849_s1, %s1342_s6 }
  0x58   : > { %p854_p12 = scmp.lt.s32.totalorder %s1180_s12, %s850_s30 }
  0x5a   : > { %p855_p13 = por %p854_p12, %p853_p11 }
  0x5c   : > { %p856_p0 = pnand %p855_p13, %p851_p10 }
  0x5e   : > { %859 = shalt.err (!%p856_p0)  }
  0x5f   : > { %315 = dma.hbm_to_vmem [thread:$0]  %s311_s9, 16, %s313_s21, [#allocation3 + $0x3] }
  0x60   : > { %p318_p1 = scmp.gt.s32.totalorder %s317_s13, 0  ;;  %p651_p2 = scmp.lt.s32.totalorder %s317_s13, 31 }
  0x61   : > { %p340_p3 = scmp.gt.s32.totalorder %s1228_s27, 0  ;;  %s360_s0 = sadd.s32 6, %s1155_s18 }
  0x62   : > { %s1378_s13 = smov (!%p318_p1, %s317_s13), 0  ;;  %p656_p4 = scmp.lt.s32.totalorder %s1228_s27, 31 }
  0x63   : > { %s1380_s13 = smov (!%p651_p2, %s1378_s13), 31  ;;  %s1244_s9 = sld [smem:[#allocation5 + %s360_s0]] }
  0x64   : > { %s341_s16 = scalar_select %p340_p3, %s1228_s27, 0 }
  0x65   : > { %s322_s25 = scalar_lea.hbm %s1342_s6, %s1380_s13  ;;  %s1056_s23 = smov [#allocation2 + $0x5]  }
  0x66   : > { %s332_s21 = sshll.u32 %s322_s25, 4  ;;  %s1246_s1 = sshll.u32 %s1056_s23, 4  ;;  %s333_s21 = int_to_ptr.hbm [resolvable:$true] %s332_s21  ;;  %s357_s1 = int_to_ptr.vmem [resolvable:$true] %s1246_s1 }
  0x67   : > { %s872_s30 = sshra.s32 %s333_s21, 4  ;;  %s873_s30 = int_to_ptr.hbm [resolvable:$true] %s872_s30 }
  0x68   : > { %s874_s26 = scalar_lea.hbm %s873_s30, 1  ;;  %p877_p8 = scmp.lt.s32.totalorder %s873_s30, %s1342_s6 }
  0x69   : > { %p875_p7 = scmp.ne.s32.totalorder %s873_s30, %s874_s26  ;;  %p878_p9 = scmp.lt.s32.totalorder %s1180_s12, %s874_s26 }
  0x6b   : > { %p879_p10 = por %p878_p9, %p877_p8 }
  0x6d   : > { %p880_p11 = pnand %p879_p10, %p875_p7 }
  0x6f   : > { %883 = shalt.err (!%p880_p11)  }
  0x70   : > { %337 = dma.hbm_to_vmem [thread:$0]  %s333_s21, 16, %s335_s20, [#allocation3 + $0x4] }
  0x71   : > { %s1382_s16 = smov (!%p656_p4, %s341_s16), 31  ;;  %s382_s10 = sadd.s32 7, %s1155_s18 }
  0x72   : > { %s344_s19 = scalar_lea.hbm %s1342_s6, %s1382_s16  ;;  %p362_p12 = scmp.gt.s32.totalorder %s1244_s9, 0 }
  0x73   : > { %s354_s11 = sshll.u32 %s344_s19, 4  ;;  %p661_p13 = scmp.lt.s32.totalorder %s1244_s9, 31  ;;  %s355_s11 = int_to_ptr.hbm [resolvable:$true] %s354_s11 }
  0x74   : > { %s896_s25 = sshra.s32 %s355_s11, 4  ;;  %s897_s25 = int_to_ptr.hbm [resolvable:$true] %s896_s25 }
  0x75   : > { %s898_s20 = scalar_lea.hbm %s897_s25, 1  ;;  %p901_p1 = scmp.lt.s32.totalorder %s897_s25, %s1342_s6 }
  0x76   : > { %p899_p0 = scmp.ne.s32.totalorder %s897_s25, %s898_s20  ;;  %p902_p2 = scmp.lt.s32.totalorder %s1180_s12, %s898_s20 }
  0x78   : > { %p903_p3 = por %p902_p2, %p901_p1 }
  0x7a   : > { %p904_p4 = pnand %p903_p3, %p899_p0 }
  0x7c   : > { %907 = shalt.err (!%p904_p4)  }
  0x7d   : > { %359 = dma.hbm_to_vmem [thread:$0]  %s355_s11, 16, %s357_s1, [#allocation3 + $0x5] }
  0x7e   : > { %s363_s16 = scalar_select %p362_p12, %s1244_s9, 0 }
  0x7f   : > { %s1057_s23 = smov [#allocation2 + $0x6]   ;;  %s383_s26 = sld [smem:[#allocation5 + %s382_s10]] }
  0x80   : > { %s378_s30 = sshll.u32 %s1057_s23, 4  ;;  %s1384_s16 = smov (!%p661_p13, %s363_s16), 31  ;;  %s379_s30 = int_to_ptr.vmem [resolvable:$true] %s378_s30 }
  0x81   : > { %s366_s0 = scalar_lea.hbm %s1342_s6, %s1384_s16 }
  0x82   : > { %s376_s19 = sshll.u32 %s366_s0, 4  ;;  %s377_s19 = int_to_ptr.hbm [resolvable:$true] %s376_s19 }
  0x83   : > { %s920_s25 = sshra.s32 %s377_s19, 4  ;;  %s921_s25 = int_to_ptr.hbm [resolvable:$true] %s920_s25 }
  0x84   : > { %s922_s20 = scalar_lea.hbm %s921_s25, 1  ;;  %p925_p8 = scmp.lt.s32.totalorder %s921_s25, %s1342_s6 }
  0x85   : > { %p923_p7 = scmp.ne.s32.totalorder %s921_s25, %s922_s20  ;;  %p926_p9 = scmp.lt.s32.totalorder %s1180_s12, %s922_s20 }
  0x87   : > { %p927_p10 = por %p926_p9, %p925_p8 }
  0x89   : > { %p928_p11 = pnand %p927_p10, %p923_p7 }
  0x8b   : > { %931 = shalt.err (!%p928_p11)  }
  0x8c   : > { %381 = dma.hbm_to_vmem [thread:$0]  %s377_s19, 16, %s379_s30, [#allocation3 + $0x6] }
  0x8d   : > { %p384_p12 = scmp.gt.s32.totalorder %s383_s26, 0  ;;  %p666_p13 = scmp.lt.s32.totalorder %s383_s26, 31 }
  0x8e   : > { %s1058_s9 = smov [#allocation2 + $0x7]  }
  0x8f   : > { %s1386_s26 = smov (!%p384_p12, %s383_s26), 0  ;;  %s400_s10 = sshll.u32 %s1058_s9, 4  ;;  %s401_s10 = int_to_ptr.vmem [resolvable:$true] %s400_s10 }
  0x90   : > { %s1388_s26 = smov (!%p666_p13, %s1386_s26), 31 }
  0x91   : > { %s388_s16 = scalar_lea.hbm %s1342_s6, %s1388_s26 }
  0x92   : > { %s398_s23 = sshll.u32 %s388_s16, 4  ;;  %s399_s23 = int_to_ptr.hbm [resolvable:$true] %s398_s23 }
  0x93   : > { %s944_s22 = sshra.s32 %s399_s23, 4  ;;  %s945_s22 = int_to_ptr.hbm [resolvable:$true] %s944_s22 }
  0x94   : > { %s946_s13 = scalar_lea.hbm %s945_s22, 1  ;;  %p949_p1 = scmp.lt.s32.totalorder %s945_s22, %s1342_s6 }
  0x95   : > { %p947_p0 = scmp.ne.s32.totalorder %s945_s22, %s946_s13  ;;  %p950_p2 = scmp.lt.s32.totalorder %s1180_s12, %s946_s13 }
  0x97   : > { %p951_p3 = por %p950_p2, %p949_p1 }
  0x99   : > { %p952_p4 = pnand %p951_p3, %p947_p0 }
  0x9b   : > { %955 = shalt.err (!%p952_p4)  }
  0x9c   : > { %403 = dma.hbm_to_vmem [thread:$0]  %s399_s23, 16, %s401_s10, [#allocation3 + $0x7] }
  0x9d   : > { %s225_s19 = scalar_lea.vmem [#allocation6], %s1153_s17 }
  0x9e   : > { %1014 = dma.done.wait [#allocation3], 16 }
  0x9f   : > { %1015 = vsyncadd [#allocation3], 4294967280 }
  0xa0   : > { %1016 = dma.done.wait [#allocation3 + $0x1], 16 }
  0xa1   : > { %1017 = vsyncadd [#allocation3 + $0x1], 4294967280 }
  0xa2   : > { %1018 = dma.done.wait [#allocation3 + $0x2], 16 }
  0xa3   : > { %1019 = vsyncadd [#allocation3 + $0x2], 4294967280 }
  0xa4   : > { %1020 = dma.done.wait [#allocation3 + $0x3], 16 }
  0xa5   : > { %1021 = vsyncadd [#allocation3 + $0x3], 4294967280 }
  0xa6   : > { %1022 = dma.done.wait [#allocation3 + $0x4], 16 }
  0xa7   : > { %1023 = vsyncadd [#allocation3 + $0x4], 4294967280 }
  0xa8   : > { %1024 = dma.done.wait [#allocation3 + $0x5], 16 }
  0xa9   : > { %1025 = vsyncadd [#allocation3 + $0x5], 4294967280 }
  0xaa   : > { %1026 = dma.done.wait [#allocation3 + $0x6], 16 }
  0xab   : > { %1027 = vsyncadd [#allocation3 + $0x6], 4294967280 }
  0xac   : > { %1028 = dma.done.wait [#allocation3 + $0x7], 16 }
  0xad   : > { %1029 = vsyncadd [#allocation3 + $0x7], 4294967280  ;;  %v1059_v0 = vmov 0   ;;  %v422_v1 = vld [vmem:[%s1162_s24] sm:$0xff]  ;;  %v1060_v2 = vmov 0.0   ;;  %v1061_v18 = vmov 128.0   ;;  %s497_s21 = scalar_lea.hbm %s1343_s7, %s1155_s18 }
  0xae   : > { %750 = vset.pattern.permute.xlu0 %v1059_v0  ;;  %vm423_vm0 = vcmp.eq.s32.totalorder %v422_v1, 0  ;;  %vm434_vm1 = vcmp.eq.s32.totalorder %v422_v1, 1  ;;  %v756_v6 = vld [vmem:[%s1339_s3] ss:$0 sm:$0xff]  ;;  %v757_v7 = vld [vmem:[%s1339_s3 + $0x1] ss:$0 sm:$0xff]  ;;  %760 = vrcp.f32 %v1061_v18 }
  0xaf   : > { %v424_v3 = vsel %vm423_vm0, 1.0, %v1060_v2  ;;  %v435_v4 = vsel %vm434_vm1, 1.0, %v1060_v2  ;;  %v421_v9 = vld [vmem:[#allocation2] sm:$0xff]  ;;  %s499_s22 = sshll.u32 %s225_s19, 4  ;;  %s501_s13 = sshll.u32 %s497_s21, 4  ;;  %s500_s22 = int_to_ptr.vmem [resolvable:$true] %s499_s22  ;;  %s502_s13 = int_to_ptr.hbm [resolvable:$true] %s501_s13 }
  0xb0   : > { %v751_v5 = vpack.i.bf16 %v435_v4, %v424_v3  ;;  %v445_v10 = vld [vmem:[%s1338_s2] sm:$0xff]  ;;  %s1359_s0 = sand.u32 1, %s1040_s29   ;;  %s982_s12 = sshra.s32 %s502_s13, 4  ;;  %s983_s12 = int_to_ptr.hbm [resolvable:$true] %s982_s12 }
  0xb1   : > { %v446_v15 = vadd.f32 %v445_v10, %v421_v9  ;;  %v758_v38 = vld [vmem:[%s1340_s4] ss:$0 sm:$0xff]  ;;  %s487_s30 = scalar_lea.sflag [#allocation7], %s1359_s0  ;;  %s984_s18 = scalar_lea.hbm %s983_s12, 8 }
  0xb2   : > { %752 = vperm.xlu0 %750, %v751_v5   ;;  %v759_v41 = vld [vmem:[%s1341_s5] ss:$0 sm:$0xff]  ;;  %p985_p7 = scmp.ne.s32.totalorder %s983_s12, %s984_s18  ;;  %s988_s20 = scalar_lea.hbm %s1343_s7, 16 }
  0xb3   : > { %p989_p10 = scmp.lt.s32.totalorder %s983_s12, %s1343_s7  ;;  %p990_p11 = scmp.lt.s32.totalorder %s988_s20, %s984_s18 }
  0xb4   : > { %v761_v19 = vpop.eup %760  ;;  %p986_p8 = pnand %p985_p7, %p1140_p5 }
  0xb5   : > { %v451_v20 = vmul.f32 128.0, %v761_v19  ;;  %vm455_vm2 = vweird.f32 %v761_v19  ;;  %p991_p12 = por %p990_p11, %p989_p10 }
  0xb6   : > { %p987_p9 = pneg %p986_p8 }
  0xb7   : > { %v452_v21 = vsub.f32 1.0, %v451_v20 }
  0xb8   : > { %p992_p13 = pnand %p991_p12, %p987_p9 }
  0xb9   : > { %v453_v22 = vmul.f32 %v761_v19, %v452_v21 }
  0xbb   : > { %v454_v23 = vadd.f32 %v761_v19, %v453_v22 }
  0xbd   : > { %v456_v24 = vsel %vm455_vm2, %v761_v19, %v454_v23 }
 0x124   : > { %v753_v8 = vpop.permute.xlu0 %752 }
 0x125   : > { %v755_v11 = vunpack.i.h.bf16 %v753_v8  ;;  %v754_v12 = vunpack.i.l.bf16 %v753_v8 }
 0x127   : > { %v443_v13 = vmul.f32 %v757_v7, %v755_v11  ;;  %v432_v14 = vmul.f32 %v756_v6, %v754_v12 }
 0x129   : > { %v444_v16 = vadd.f32 %v443_v13, %v432_v14 }
 0x12b   : > { %v447_v17 = vadd.f32 %v446_v15, %v444_v16 }
 0x12d   : > { %448 = vadd.xlane.f32.xlu0 %v447_v17 }
 0x1a0   : > { %v449_v25 = vpop.xlane.xlu0 %448 }
 0x1a1   : > { %v457_v26 = vmul.f32 %v456_v24, %v449_v25 }
 0x1a3   : > { %v458_v27 = vsub.f32 %v447_v17, %v457_v26 }
 0x1a5   : > { %v459_v28 = vmul.f32 %v458_v27, %v458_v27 }
 0x1a7   : > { %460 = vadd.xlane.f32.xlu1 %v459_v28 }
 0x21a   : > { %v461_v29 = vpop.xlane.xlu1 %460 }
 0x21b   : > { %v462_v30 = vmul.f32 %v461_v29, %v456_v24 }
 0x21d   : > { %v463_v31 = vadd.f32 1e-12, %v462_v30 }
 0x21f   : > { %762 = vrsqrt.f32 %v463_v31  ;;  %vm470_vm4 = vweird.f32 %v463_v31 }
 0x225   : > { %v763_v32 = vpop.eup %762 }
 0x226   : > { %v465_v33 = vmul.f32 %v763_v32, %v463_v31  ;;  %vm471_vm3 = vweird.f32 %v763_v32 }
 0x227   : > { %vm472_vm5 = vmor %vm470_vm4, %vm471_vm3 }
 0x228   : > { %v466_v34 = vmul.f32 %v763_v32, %v465_v33 }
 0x22a   : > { %v467_v35 = vmul.f32 0.5, %v466_v34 }
 0x22c   : > { %v468_v36 = vsub.f32 1.5, %v467_v35 }
 0x22e   : > { %v469_v37 = vmul.f32 %v763_v32, %v468_v36 }
 0x230   : > { %v473_v39 = vsel %vm472_vm5, %v763_v32, %v469_v37 }
 0x231   : > { %v474_v40 = vmul.f32 %v473_v39, %v458_v27 }
 0x233   : > { %v479_v42 = vmul.f32 %v758_v38, %v474_v40 }
 0x235   : > { %v484_v43 = vadd.f32 %v759_v41, %v479_v42 }
 0x237   : > { %485 = vst [vmem:[%s225_s19] sm:$0xff] %v484_v43 }
 0x238   : > { %995 = shalt.err (!%p992_p13)
}
 0x239   : > { %699 = dma.vmem_to_hbm [thread:$0]  (%p1140_p5), %s500_s22, 128, %s502_s13, %s487_s30  }
 0x23a PF: > { %p705_p0 = scmp.ge.s32.totalorder %s1048_s8, 2  ;;  %s513_s17 = sand.u32 1, %s1036_s28  }
 0x23b   : > { %s514_s19 = scalar_lea.sflag [#allocation7], %s513_s17 }
 0x23c   : > { %p702_p1 = pnand %p705_p0, %p1144_p6 }
 0x23e   : > { %p703_p2 = pneg %p702_p1 }
 0x240   : > { %1031 = dma.done.wait (%p703_p2), %s514_s19, 128  }
 0x241   : > { %1033 = vsyncadd (%p703_p2), %s514_s19, 4294967168  ;;  %s1360_s8 = sld [smem:[#allocation37_spill]]  ;;  %s1363_s28 = smov %s1040_s29 }
 0x242   : > { %s1361_s24 = sld [smem:[#allocation36_spill]] }
 0x243   : > { %s1362_s30 = sld [smem:[#allocation38_spill]] }
 0x247   : > { %p25_p3 = scmp.ge.s32.totalorder %s1360_s8, 4  }
 0x248   : > { %s1364_s29 = smov %s1361_s24 }
 0x249   :  { %27 = sbr.rel (!%p25_p3) target bundleno = 9 (0x9), region = 136 }
 0x24e   :  { %520 = vsyncpa [#allocation7], 1 }
 0x24f   :  { %522 = vsyncpa [#allocation7 + $0x1], 1 }
 0x250   :  { %523 = vsyncmov [#allocation3] }
 0x253   :  { %s524_s14 = vpop.sfrf %523 }
 0x254   :  { %p675_p5 = scmp.ne.s32.totalorder %s524_s14, 0 }
 0x256   :  { %528 = shalt.err (%p675_p5)  }
 0x257   :  { %530 = vsyncmov [#allocation3 + $0x1] }
 0x25a   :  { %s531_s15 = vpop.sfrf %530 }
 0x25b   :  { %p676_p6 = scmp.ne.s32.totalorder %s531_s15, 0 }
 0x25d   :  { %535 = shalt.err (%p676_p6)  }
 0x25e   :  { %537 = vsyncmov [#allocation3 + $0x2] }
 0x261   :  { %s538_s9 = vpop.sfrf %537 }
 0x262   :  { %p677_p4 = scmp.ne.s32.totalorder %s538_s9, 0 }
 0x264   :  { %542 = shalt.err (%p677_p4)  }
 0x265   :  { %544 = vsyncmov [#allocation3 + $0x3] }
 0x268   :  { %s545_s10 = vpop.sfrf %544 }
 0x269   :  { %p678_p7 = scmp.ne.s32.totalorder %s545_s10, 0 }
 0x26b   :  { %549 = shalt.err (%p678_p7)  }
 0x26c   :  { %551 = vsyncmov [#allocation3 + $0x4] }
 0x26f   :  { %s552_s8 = vpop.sfrf %551 }
 0x270   :  { %p679_p8 = scmp.ne.s32.totalorder %s552_s8, 0 }
 0x272   :  { %556 = shalt.err (%p679_p8)  }
 0x273   :  { %558 = vsyncmov [#allocation3 + $0x5] }
 0x276   :  { %s559_s2 = vpop.sfrf %558 }
 0x277   :  { %p680_p9 = scmp.ne.s32.totalorder %s559_s2, 0 }
 0x279   :  { %563 = shalt.err (%p680_p9)  }
 0x27a   :  { %565 = vsyncmov [#allocation3 + $0x6] }
 0x27d   :  { %s566_s3 = vpop.sfrf %565 }
 0x27e   :  { %p681_p10 = scmp.ne.s32.totalorder %s566_s3, 0 }
 0x280   :  { %570 = shalt.err (%p681_p10)  }
 0x281   :  { %572 = vsyncmov [#allocation3 + $0x7] }
 0x284   :  { %s573_s4 = vpop.sfrf %572 }
 0x285   :  { %p682_p11 = scmp.ne.s32.totalorder %s573_s4, 0 }
 0x287   :  { %577 = shalt.err (%p682_p11)  }

</bundles_post_ra>
